<compile_context>
chip_gen: v7x
topology: tpu7x:2x2x1
jax: 0.10.0
libtpu: 0.0.40
codegen_flags: <defaults>
</compile_context>

<pallas_src>
import functools

import jax
import jax.numpy as jnp
from jax.experimental import pallas as pl
from jax.experimental.pallas import tpu as pltpu

LANE = 128
_MIB = 1024 * 1024


def _round_up(a, b):
    return (a + b - 1) // b * b


def _vmem_budgets():
    """Per-generation (max_tile_bytes, vmem_limit_bytes)."""
    cap = None
    try:
        cap = getattr(pltpu.get_tpu_info(), "vmem_capacity_bytes", None)
    except Exception:
        cap = None
    if cap is None or cap >= 96 * _MIB:   # v5e / v6e: 128 MiB physical VMEM
        return 16 * _MIB, 64 * _MIB
    # v7x: 64 MiB per TensorCore -> 2x tile + weights + scratch well inside it
    return 12 * _MIB, 40 * _MIB


# ---------------------------------------------------------------------------
# Streaming path: grid = (N, HW tiles), two-phase accumulate / finalize.
# ---------------------------------------------------------------------------
def _ca_stream_kernel(x_ref, w1_ref, w2_ref, o_ref, sum_acc, max_acc, *,
                      hw_total, num_k):
    # x_ref  : (1, C, hw_blk)  input dtype (f32 or bf16)
    # w1_ref : (Cr, C) f32, w2_ref : (C, Cr) f32
    # o_ref  : (1, C, 1) input dtype
    # sum_acc / max_acc : (C, LANE) f32 scratch, persistent over the HW axis.
    k = pl.program_id(1)
    C = x_ref.shape[1]
    hw_blk = x_ref.shape[2]
    n_chunks = hw_blk // LANE

    # Static last-tile decomposition (hw_total, hw_blk, num_k are Python ints).
    rem_last = hw_total - (num_k - 1) * hw_blk        # 1 .. hw_blk valid lanes
    full_last = rem_last // LANE                      # fully-valid chunks
    partial = rem_last % LANE                         # lanes in the partial chunk

    @pl.when(k == 0)
    def _init():
        sum_acc[...] = jnp.zeros_like(sum_acc)
        max_acc[...] = jnp.full_like(max_acc, -jnp.inf)

    def accum(s, carry):
        # Accumulate through VMEM scratch (ld/st slots are idle in a mem-bound
        # stream) so no whole (C,128) accumulators live in vregs.
        off = pl.multiple_of(s * LANE, LANE)
        chunk = x_ref[0, :, pl.ds(off, LANE)].astype(jnp.float32)   # (C, 128)
        sum_acc[...] += chunk
        max_acc[...] = jnp.maximum(max_acc[...], chunk)
        return carry

    is_last = k == (num_k - 1)

    if num_k > 1:
        @pl.when(jnp.logical_not(is_last))
        def _full_tiles():
            # Unmasked fast path: every chunk of a non-last tile is valid.
            jax.lax.fori_loop(0, n_chunks, accum, 0,
                              unroll=min(8, n_chunks))

    @pl.when(is_last)
    def _last_tile_and_finalize():
        if full_last > 0:
            jax.lax.fori_loop(0, full_last, accum, 0,
                              unroll=min(8, full_last))
        if partial > 0:
            # Single statically-known partial chunk; chunks beyond it are
            # entirely padding and are never loaded.
            s = full_last
            chunk = x_ref[0, :, s * LANE:(s + 1) * LANE].astype(jnp.float32)
            lane = jax.lax.broadcasted_iota(jnp.int32, (C, LANE), 1)
            valid = lane < partial
            sum_acc[...] += jnp.where(valid, chunk, 0.0)
            max_acc[...] = jnp.maximum(max_acc[...],
                                       jnp.where(valid, chunk, -jnp.inf))

        # Finalize: one cross-lane reduce, fused avg+max FC, sigmoid, store.
        inv_hw = jnp.float32(1.0 / hw_total)
        avg = jnp.sum(sum_acc[...], axis=-1, keepdims=True) * inv_hw   # (C, 1)
        mx = jnp.max(max_acc[...], axis=-1, keepdims=True)             # (C, 1)
        col = jax.lax.broadcasted_iota(jnp.int32, (C, 2), 1)
        pooled = jnp.where(col == 0, avg, mx)                          # (C, 2)
        h = jnp.maximum(
            jnp.dot(w1_ref[...], pooled, preferred_element_type=jnp.float32),
            0.0)                                                       # (Cr, 2)
        y = jnp.dot(w2_ref[...], h, preferred_element_type=jnp.float32)  # (C, 2)
        att = jax.nn.sigmoid(y[:, 0:1] + y[:, 1:2])                       # (C, 1)
        o_ref[0] = att.astype(o_ref.dtype)


# ---------------------------------------------------------------------------
# Small-spatial fast path: fold batch, reduce HW directly per block.
# ---------------------------------------------------------------------------
def _ca_small_kernel(x_ref, w1t_ref, w2t_ref, o_ref):
    # x_ref : (B_blk, C, HW); w1t: (C, Cr); w2t: (Cr, C); o_ref: (B_blk, C, 1)
    xb = x_ref[...].astype(jnp.float32)
    avg = jnp.mean(xb, axis=-1)          # (B, C)   exact HW extent -> no masking
    mx = jnp.max(xb, axis=-1)            # (B, C)

    def fc(v):
        h = jnp.maximum(
            jnp.dot(v, w1t_ref[...], preferred_element_type=jnp.float32), 0.0)
        return jnp.dot(h, w2t_ref[...], preferred_element_type=jnp.float32)

    att = jax.nn.sigmoid(fc(avg) + fc(mx))          # (B, C)
    o_ref[...] = att.reshape(o_ref.shape).astype(o_ref.dtype)


# ---------------------------------------------------------------------------
# Wrapper
# ---------------------------------------------------------------------------
def channel_attention(x, w1, w2, *,
                      max_tile_bytes=None,
                      vmem_limit_bytes=None,
                      small_hw_batch_fold=True):
    """x: (N, C, H, W); w1: (Cr, C, 1, 1); w2: (C, Cr, 1, 1) -> (N, C, 1, 1)."""
    N, C, H, W = x.shape
    Cr = w1.shape[0]
    HW = H * W

    auto_tile, auto_vmem = _vmem_budgets()
    if max_tile_bytes is None:
        max_tile_bytes = auto_tile
    if vmem_limit_bytes is None:
        vmem_limit_bytes = auto_vmem

    x3 = x.reshape(N, C, HW)                        # keep input dtype (bf16 stays bf16)
    w1m = w1.reshape(Cr, C).astype(jnp.float32)     # (Cr, C)
    w2m = w2.reshape(C, Cr).astype(jnp.float32)     # (C, Cr)

    itemsize = jnp.dtype(x3.dtype).itemsize
    hw_pad = _round_up(HW, LANE)
    row_bytes = _round_up(C, 8) * itemsize
    per_batch_bytes = row_bytes * hw_pad

    # ---------------- Fast path: whole HW fits in one tile ----------------
    if small_hw_batch_fold and per_batch_bytes <= max_tile_bytes:
        b_blk = max(1, min(N, max_tile_bytes // max(per_batch_bytes, 1)))
        if N >= 2:
            # Keep >= 2 grid steps so megacore (v7x) can split the batch axis.
            b_blk = min(b_blk, (N + 1) // 2)
        grid = (pl.cdiv(N, b_blk),)

        cost = pl.CostEstimate(
            flops=int(2 * N * C * HW + 8 * N * C * Cr),
            transcendentals=int(N * C),
            bytes_accessed=int(x3.size * itemsize + (w1m.size + w2m.size) * 4
                               + N * C * itemsize),
        )
        out = pl.pallas_call(
            _ca_small_kernel,
            out_shape=jax.ShapeDtypeStruct((N, C, 1), x.dtype),
            grid_spec=pltpu.PrefetchScalarGridSpec(
                num_scalar_prefetch=0,
                grid=grid,
                in_specs=[
                    pl.BlockSpec((b_blk, C, HW), lambda b: (b, 0, 0)),
                    pl.BlockSpec((C, Cr), lambda b: (0, 0)),
                    pl.BlockSpec((Cr, C), lambda b: (0, 0)),
                ],
                out_specs=pl.BlockSpec((b_blk, C, 1), lambda b: (b, 0, 0)),
            ),
            compiler_params=pltpu.CompilerParams(
                dimension_semantics=("parallel",),
                vmem_limit_bytes=vmem_limit_bytes,
            ),
            cost_estimate=cost,
        )(x3, w1m.T, w2m.T)
        return out.reshape(N, C, 1, 1)

    # ---------------- Streaming path: grid = (N, HW tiles) ----------------
    cap_lanes = max(LANE, (max_tile_bytes // row_bytes) // LANE * LANE)
    hw_blk = min(hw_pad, cap_lanes)
    num_hw_tiles = pl.cdiv(HW, hw_blk)
    grid = (N, num_hw_tiles)

    kernel = functools.partial(_ca_stream_kernel, hw_total=HW, num_k=num_hw_tiles)

    cost = pl.CostEstimate(
        flops=int(2 * N * C * HW + 8 * N * C * Cr),
        transcendentals=int(N * C),
        bytes_accessed=int(x3.size * itemsize + (w1m.size + w2m.size) * 4
                           + N * C * itemsize),
    )

    out = pl.pallas_call(
        kernel,
        out_shape=jax.ShapeDtypeStruct((N, C, 1), x.dtype),
        grid_spec=pltpu.PrefetchScalarGridSpec(
            num_scalar_prefetch=0,
            grid=grid,
            in_specs=[
                pl.BlockSpec((1, C, hw_blk), lambda n, k: (n, 0, k)),
                pl.BlockSpec((Cr, C), lambda n, k: (0, 0)),
                pl.BlockSpec((C, Cr), lambda n, k: (0, 0)),
            ],
            out_specs=pl.BlockSpec((1, C, 1), lambda n, k: (n, 0, 0)),
            scratch_shapes=[
                pltpu.VMEM((C, LANE), jnp.float32),   # running sum
                pltpu.VMEM((C, LANE), jnp.float32),   # running max
            ],
        ),
        compiler_params=pltpu.CompilerParams(
            dimension_semantics=("parallel", "arbitrary"),
            vmem_limit_bytes=vmem_limit_bytes,
        ),
        cost_estimate=cost,
    )(x3, w1m, w2m)
    return out.reshape(N, C, 1, 1)


def channel_attention_ref(x, w1, w2):
    """Pure-JAX reference matching the PyTorch module."""
    N, C, H, W = x.shape
    Cr = w1.shape[0]
    xf = x.astype(jnp.float32)
    avg = jnp.mean(xf, axis=(2, 3))                  # (N, C)
    mx = jnp.max(xf, axis=(2, 3))                    # (N, C)
    w1m = w1.reshape(Cr, C).astype(jnp.float32)
    w2m = w2.reshape(C, Cr).astype(jnp.float32)

    def fc(v):
        h = jnp.maximum(v @ w1m.T, 0.0)
        return h @ w2m.T

    return jax.nn.sigmoid(fc(avg) + fc(mx)).reshape(N, C, 1, 1)


if __name__ == "__main__":
    # in_planes must be >= 16 (module hardcodes in_planes // 16); keep shapes small.
    N, C, H, W = 2, 32, 16, 16
    Cr = C // 16

    key = jax.random.PRNGKey(0)
    kx, k1, k2 = jax.random.split(key, 3)
    x = jax.random.normal(kx, (N, C, H, W), dtype=jnp.float32)
    # Deterministic synthetic conv weights (Conv2d, kernel_size=1, bias=False).
    w1 = jax.random.normal(k1, (Cr, C, 1, 1), dtype=jnp.float32) * 0.1
    w2 = jax.random.normal(k2, (C, Cr, 1, 1), dtype=jnp.float32) * 0.1

    # 1) Default path: small spatial -> batch-folded fast path.
    out = jax.block_until_ready(channel_attention(x, w1, w2))
    ref = channel_attention_ref(x, w1, w2)
    assert out.shape == (N, C, 1, 1)
    assert jnp.allclose(out, ref, atol=1e-5, rtol=1e-5)

    # 2) Ragged spatial size (H*W = 63) on the fast path.
    x_ragged = jax.random.normal(kx, (N, C, 7, 9), dtype=jnp.float32)
    out_r = jax.block_until_ready(channel_attention(x_ragged, w1, w2))
    ref_r = channel_attention_ref(x_ragged, w1, w2)
    assert jnp.allclose(out_r, ref_r, atol=1e-5, rtol=1e-5)

    # 3) bf16 activations on the fast path (f32 accumulation in-kernel).
    x_bf16 = x.astype(jnp.bfloat16)
    out_b = jax.block_until_ready(channel_attention(x_bf16, w1, w2))
    ref_b = channel_attention_ref(x_bf16, w1, w2)
    assert jnp.allclose(out_b.astype(jnp.float32), ref_b, atol=1e-2, rtol=1e-2)

    # 4) Forced streaming path with ragged tail: HW=400, hw_blk=256 ->
    #    2 tiles, last tile = 1 full chunk + 16-lane partial chunk.
    x_s1 = jax.random.normal(k1, (N, C, 20, 20), dtype=jnp.float32)
    out_s1 = jax.block_until_ready(channel_attention(
        x_s1, w1, w2, max_tile_bytes=32 * 1024, small_hw_batch_fold=False))
    ref_s1 = channel_attention_ref(x_s1, w1, w2)
    assert jnp.allclose(out_s1, ref_s1, atol=1e-5, rtol=1e-5)

    # 5) Forced streaming path, exact multiple: HW=256, hw_blk=128 -> 2 full tiles.
    out_s2 = jax.block_until_ready(channel_attention(
        x, w1, w2, max_tile_bytes=16 * 1024, small_hw_batch_fold=False))
    assert jnp.allclose(out_s2, ref, atol=1e-5, rtol=1e-5)

    print("KERNEL_OK")
</pallas_src>

<mosaic_0001>
module attributes {stable_mosaic.version = 11 : i64} {
  func.func @_ca_small_kernel(%arg0: i32, %arg1: memref<1x32x256xf32, #tpu.memory_space<vmem>>, %arg2: memref<32x2xf32, #tpu.memory_space<vmem>>, %arg3: memref<2x32xf32, #tpu.memory_space<vmem>>, %arg4: memref<1x32x1xf32, #tpu.memory_space<vmem>>) attributes {dimension_semantics = [#tpu.dimension_semantics<parallel>], iteration_bounds = array<i64: 2>, scalar_prefetch = 0 : i64, scratch_operands = 0 : i64, tpu.core_type = #tpu.core_type<tc>, window_params = [{transform_indices = @transform_0, window_bounds = array<i64: 1, 32, 256>}, {pipeline_mode = #tpu.pipeline_mode<synchronous>, transform_indices = @transform_1, window_bounds = array<i64: 32, 2>}, {pipeline_mode = #tpu.pipeline_mode<synchronous>, transform_indices = @transform_2, window_bounds = array<i64: 2, 32>}, {transform_indices = @transform_3, window_bounds = array<i64: 1, 32, 1>}]} {
    %c0 = arith.constant 0 : index
    %c0_0 = arith.constant 0 : index
    %c0_1 = arith.constant 0 : index
    %0 = vector.load %arg1[%c0, %c0_0, %c0_1] : memref<1x32x256xf32, #tpu.memory_space<vmem>>, vector<1x32x256xf32>
    %cst = arith.constant dense<0.000000e+00> : vector<1x32xf32>
    %1 = vector.multi_reduction <add>, %0, %cst [2] : vector<1x32x256xf32> to vector<1x32xf32>
    %cst_2 = arith.constant 2.560000e+02 : f32
    %2 = vector.broadcast %cst_2 : f32 to vector<1x32xf32>
    %3 = arith.divf %1, %2 : vector<1x32xf32>
    %cst_3 = arith.constant dense<0xFF800000> : vector<1x32xf32>
    %4 = vector.multi_reduction <maximumf>, %0, %cst_3 [2] : vector<1x32x256xf32> to vector<1x32xf32>
    %c0_4 = arith.constant 0 : index
    %c0_5 = arith.constant 0 : index
    %5 = vector.load %arg2[%c0_4, %c0_5] : memref<32x2xf32, #tpu.memory_space<vmem>>, vector<32x2xf32>
    %cst_6 = arith.constant dense<0.000000e+00> : vector<1x2xf32>
    %6 = tpu.matmul %3, %5, %cst_6 {dimension_numbers = #tpu.dot_dimension_numbers<[1], [0], [0], [1], [0, 0, 1, 1], [], []>} : vector<1x32xf32>, vector<32x2xf32>, vector<1x2xf32> -> vector<1x2xf32>
    %cst_7 = arith.constant 0.000000e+00 : f32
    %7 = vector.broadcast %cst_7 : f32 to vector<1x2xf32>
    %8 = arith.maximumf %6, %7 : vector<1x2xf32>
    %c0_8 = arith.constant 0 : index
    %c0_9 = arith.constant 0 : index
    %9 = vector.load %arg3[%c0_8, %c0_9] : memref<2x32xf32, #tpu.memory_space<vmem>>, vector<2x32xf32>
    %cst_10 = arith.constant dense<0.000000e+00> : vector<1x32xf32>
    %10 = tpu.matmul %8, %9, %cst_10 {dimension_numbers = #tpu.dot_dimension_numbers<[1], [0], [0], [1], [0, 0, 1, 1], [], []>} : vector<1x2xf32>, vector<2x32xf32>, vector<1x32xf32> -> vector<1x32xf32>
    %c0_11 = arith.constant 0 : index
    %c0_12 = arith.constant 0 : index
    %11 = vector.load %arg2[%c0_11, %c0_12] : memref<32x2xf32, #tpu.memory_space<vmem>>, vector<32x2xf32>
    %cst_13 = arith.constant dense<0.000000e+00> : vector<1x2xf32>
    %12 = tpu.matmul %4, %11, %cst_13 {dimension_numbers = #tpu.dot_dimension_numbers<[1], [0], [0], [1], [0, 0, 1, 1], [], []>} : vector<1x32xf32>, vector<32x2xf32>, vector<1x2xf32> -> vector<1x2xf32>
    %cst_14 = arith.constant 0.000000e+00 : f32
    %13 = vector.broadcast %cst_14 : f32 to vector<1x2xf32>
    %14 = arith.maximumf %12, %13 : vector<1x2xf32>
    %c0_15 = arith.constant 0 : index
    %c0_16 = arith.constant 0 : index
    %15 = vector.load %arg3[%c0_15, %c0_16] : memref<2x32xf32, #tpu.memory_space<vmem>>, vector<2x32xf32>
    %cst_17 = arith.constant dense<0.000000e+00> : vector<1x32xf32>
    %16 = tpu.matmul %14, %15, %cst_17 {dimension_numbers = #tpu.dot_dimension_numbers<[1], [0], [0], [1], [0, 0, 1, 1], [], []>} : vector<1x2xf32>, vector<2x32xf32>, vector<1x32xf32> -> vector<1x32xf32>
    %17 = arith.addf %10, %16 : vector<1x32xf32>
    %18 = arith.negf %17 : vector<1x32xf32>
    %19 = math.exp %18 : vector<1x32xf32>
    %cst_18 = arith.constant 1.000000e+00 : f32
    %20 = vector.broadcast %cst_18 : f32 to vector<1x32xf32>
    %21 = arith.addf %20, %19 : vector<1x32xf32>
    %22 = arith.divf %20, %21 : vector<1x32xf32>
    %23 = vector.shape_cast %22 : vector<1x32xf32> to vector<1x32x1xf32>
    %c0_19 = arith.constant 0 : index
    %c0_20 = arith.constant 0 : index
    %c0_21 = arith.constant 0 : index
    %24 = vector.load %arg4[%c0_19, %c0_20, %c0_21] : memref<1x32x1xf32, #tpu.memory_space<vmem>>, vector<1x32x1xf32>
    tpu.vector_store %arg4[%c0_19, %c0_20, %c0_21], %23 {strides = array<i32>} : memref<1x32x1xf32, #tpu.memory_space<vmem>>, vector<1x32x1xf32>,
    return
  }
  func.func @transform_0(%arg0: i32) -> (i32, i32, i32) {
    %c0_i32 = arith.constant 0 : i32
    %c0_i32_0 = arith.constant 0 : i32
    %c0_i32_1 = arith.constant 0 : i32
    return %arg0, %c0_i32, %c0_i32_0 : i32, i32, i32
  }
  func.func @transform_1(%arg0: i32) -> (i32, i32) {
    %c0_i32 = arith.constant 0 : i32
    %c0_i32_0 = arith.constant 0 : i32
    %c0_i32_1 = arith.constant 0 : i32
    return %c0_i32, %c0_i32_0 : i32, i32
  }
  func.func @transform_2(%arg0: i32) -> (i32, i32) {
    %c0_i32 = arith.constant 0 : i32
    %c0_i32_0 = arith.constant 0 : i32
    %c0_i32_1 = arith.constant 0 : i32
    return %c0_i32, %c0_i32_0 : i32, i32
  }
  func.func @transform_3(%arg0: i32) -> (i32, i32, i32) {
    %c0_i32 = arith.constant 0 : i32
    %c0_i32_0 = arith.constant 0 : i32
    %c0_i32_1 = arith.constant 0 : i32
    return %arg0, %c0_i32, %c0_i32_0 : i32, i32, i32
  }
}

</mosaic_0001>

<bundles_post_ra>
// kernel: tpu_custom_call.1
= control target key start
LH: loop header
LB: loop body
LE: loop exit
PB: predicated region body
PF: predicated region fallthrough
CT: control target
= control target key end

     0   :  { %8 = vsyncpa [#allocation3], 0  ;;  %s1353_s0 = inlined_call_operand.hbm [shape: f32[2,32,256], index: 0, kind: input, shape index: {}]   ;;  %s1354_s1 = inlined_call_operand.hbm [shape: f32[32,2], index: 1, kind: input, shape index: {}]   ;;  %s1355_s2 = inlined_call_operand.hbm [shape: f32[2,32], index: 2, kind: input, shape index: {}]   ;;  %s1356_s3 = inlined_call_operand.hbm [shape: f32[2,32,1], index: 3, kind: output, shape index: {}]  }
   0x1   :  { %10 = vsyncpa [#allocation3 + $0x1], 0 }
   0x2   :  { %11 = vsyncpa [#allocation6], 0 }
   0x3   :  { %12 = vsyncpa [#allocation4], 0 }
   0x4   :  { %14 = vsyncpa [#allocation4 + $0x1], 0  ;;  %s1103_s12 = smov 0   ;;  %s1105_s13 = smov 0  }
   0x5   :  { %s1107_s14 = smov 0   ;;  %s1109_s15 = smov 0  }
   0x6 LB: > { %s1124_s16 = sadd.s32 4294967295, %s1068_s15   ;;  %s746_s17 = sadd.s32 4294967294, %s1068_s15   ;;  %s1068_s15 = sphi %s1109_s15, %s1376_s15   ;;  %s1064_s14 = sphi %s1107_s14, %s1375_s14   ;;  %s1060_s13 = sphi %s1105_s13, %s1374_s13   ;;  %s1056_s12 = sphi %s1103_s12, %s1373_s12  }
   0x7   : > { %p40_p0 = scmp.ne.s32.totalorder %s1060_s13, %s1056_s12  ;;  %p1357_p1 = scmp.eq.s32.totalorder %s1124_s16, 0 }
   0x8   : > { %p112_p3 = scmp.eq.s32.totalorder %s746_s17, 1  ;;  %p747_p5 = scmp.ge.s32.totalorder %s1068_s15, 1 }
   0x9   : > { %p1133_p4 = por %p1357_p1, %p40_p0  ;;  %p119_p7 = scmp.lt.s32.totalorder %s1068_s15, 3 }
   0xa   : > { %p1138_p6 = por %p112_p3, %p40_p0  ;;  %s1070_s21 = smov [#allocation5]  }
   0xb   : > { %s1360_s18 = scalar_select %p1133_p4, 1, 0 }
   0xc   : > { %s1361_s19 = scalar_select %p1138_p6, 1, 0 }
   0xd   : > { %p1143_p8 = pnand %p747_p5, %p119_p7  ;;  %s131_s22 = sshll.u32 %s1070_s21, 4  ;;  %s1147_s22 = int_to_ptr.vmem [resolvable:$true] %s131_s22 }
   0xe   : > { %s1071_s24 = smov [#allocation7]   ;;  %s912_s28 = scalar_lea.hbm %s1354_s1, 512 }
   0xf   : > { %p844_p9 = pneg %p1143_p8  ;;  %s145_s25 = sshll.u32 %s1071_s24, 4  ;;  %s1158_s25 = int_to_ptr.vmem [resolvable:$true] %s145_s25 }
  0x10   : > { %p913_p12 = scmp.ne.s32.totalorder %s1354_s1, %s912_s28  ;;  %p919_p5 = scmp.lt.u32.totalorder %s912_s28, %s1354_s1 }
  0x11   : > { %p1154_p11 = pnand %p844_p9, %p1357_p1 }
  0x13   : > { %p914_p13 = pneg %p1154_p11 }
  0x15   : > { %p915_p0 = pnand %p914_p13, %p913_p12 }
  0x17   : > { %p916_p3 = pneg %p915_p0 }
  0x19   : > { %p921_p7 = pnand %p919_p5, %p916_p3 }
  0x1b   : > { %924 = shalt.err (!%p921_p7)
}
  0x1c   : > { %s925_s6 = scalar_lea.vmem %s1147_s22, 512  ;;  %p933_p2 = scmp.lt.s32.totalorder %s1147_s22, %s1147_s22 }
  0x1d   : > { %p926_p9 = scmp.ne.s32.totalorder %s1147_s22, %s925_s6  ;;  %p934_p12 = scmp.lt.s32.totalorder %s925_s6, %s925_s6 }
  0x1f   : > { %p928_p10 = pnand %p926_p9, %p914_p13  ;;  %p935_p0 = por %p934_p12, %p933_p2 }
  0x21   : > { %p929_p1 = pneg %p928_p10 }
  0x23   : > { %p936_p6 = pnand %p935_p0, %p929_p1 }
  0x25   : > { %939 = shalt.err (!%p936_p6)
}
  0x26   : > { %s1072_s7 = smov 128   ;;  %s1073_s8 = smov 8  }
  0x27   : > { %847 = dma.hbm_to_vmem [thread:$0]  (!%p1154_p11), %s1354_s1, 512, %s1147_s22, [#allocation6], %s1072_s7, %s1072_s7, %s1073_s8  }
  0x28   : > { %s940_s21 = scalar_lea.hbm %s1355_s2, 32 }
  0x29   : > { %p941_p2 = scmp.ne.s32.totalorder %s1355_s2, %s940_s21  ;;  %p947_p10 = scmp.lt.u32.totalorder %s940_s21, %s1355_s2 }
  0x2b   : > { %p943_p1 = pnand %p941_p2, %p914_p13 }
  0x2d   : > { %p944_p6 = pneg %p943_p1 }
  0x2f   : > { %p949_p3 = pnand %p947_p10, %p944_p6 }
  0x31   : > { %952 = shalt.err (!%p949_p3)
}
  0x32   : > { %s953_s22 = scalar_lea.vmem %s1158_s25, 32  ;;  %p961_p12 = scmp.lt.s32.totalorder %s1158_s25, %s1158_s25 }
  0x33   : > { %p954_p5 = scmp.ne.s32.totalorder %s1158_s25, %s953_s22  ;;  %p962_p0 = scmp.lt.s32.totalorder %s953_s22, %s953_s22 }
  0x35   : > { %p956_p7 = pnand %p954_p5, %p914_p13  ;;  %p963_p2 = por %p962_p0, %p961_p12 }
  0x37   : > { %p957_p9 = pneg %p956_p7 }
  0x39   : > { %p964_p1 = pnand %p963_p2, %p957_p9 }
  0x3b   : > { %967 = shalt.err (!%p964_p1)
}
  0x3c   : > { %850 = dma.hbm_to_vmem [thread:$0]  (!%p1154_p11), %s1355_s2, 32, %s1158_s25, [#allocation6]  }
  0x3d   : > { %s1213_s4 = sadd.s32 1, %s1068_s15   ;;  %s27_s23 = sadd.s32 1, %s1064_s14 }
  0x3e   : > { %s24_s5 = ssub.s32 %s1068_s15, %s1213_s4  ;;  %p34_p13 = scmp.ne.s32.totalorder %s1064_s14, %s1060_s13 }
  0x3f   : > { %p25_p6 = scmp.eq.s32.totalorder %s24_s5, 0  ;;  %p35_p10 = scmp.eq.s32.totalorder %s1068_s15, 0 }
  0x40   : > { %p1364_p3 = scmp.eq.s32.totalorder %s1124_s16, 1  ;;  %p861_p7 = scmp.lt.s32.totalorder %s1068_s15, 2 }
  0x41   : > { %s1229_s7 = scalar_select %p25_p6, %s1064_s14, %s27_s23  }
  0x42   : > { %p1223_p5 = por %p1364_p3, %p34_p13  ;;  %p36_p9 = por %p35_p10, %p34_p13 }
  0x43   : > { %s156_s8 = sand.u32 1, %s1064_s14   ;;  %s771_s25 = sshll.u32 %s1068_s15, 10 }
  0x44   : > { %s1365_s6 = scalar_select %p1223_p5, 1, 0 }
  0x45   : > { %s751_s9 = sshll.u32 %s156_s8, 6  ;;  %s1236_s17 = scalar_lea.hbm %s1353_s0, %s771_s25 }
  0x46   : > { %s160_s21 = scalar_lea.vmem [#allocation2], %s751_s9  ;;  %p1240_p11 = pnand %p861_p7, %p36_p9 }
  0x47   : > { %s167_s24 = sshll.u32 %s160_s21, 4  ;;  %s1244_s27 = scalar_lea.sflag [#allocation3], %s156_s8  ;;  %s1238_s24 = int_to_ptr.vmem [resolvable:$true] %s167_s24 }
  0x48   : > { %s968_s28 = scalar_lea.hbm %s1236_s17, 1024  ;;  %p970_p0 = pneg %p1240_p11 }
  0x49   : > { %p969_p12 = scmp.ne.s32.totalorder %s1236_s17, %s968_s28  ;;  %s973_s30 = scalar_lea.hbm %s1353_s0, 2048 }
  0x4a   : > { %p974_p13 = scmp.lt.u32.totalorder %s1236_s17, %s1353_s0  ;;  %p975_p6 = scmp.lt.u32.totalorder %s973_s30, %s968_s28 }
  0x4b   : > { %p971_p2 = pnand %p970_p0, %p969_p12  ;;  %p977_p3 = scmp.lt.u32.totalorder %s968_s28, %s1236_s17 }
  0x4c   : > { %p976_p10 = por %p975_p6, %p974_p13 }
  0x4d   : > { %p972_p1 = pneg %p971_p2 }
  0x4e   : > { %p978_p7 = por %p977_p3, %p976_p10 }
  0x50   : > { %p979_p9 = pnand %p978_p7, %p972_p1 }
  0x52   : > { %982 = shalt.err (!%p979_p9)
}
  0x53   : > { %s983_s8 = scalar_lea.vmem %s1238_s24, 1024  ;;  %s1074_s9 = smov [#allocation2]  }
  0x54   : > { %p984_p12 = scmp.ne.s32.totalorder %s1238_s24, %s983_s8  ;;  %s988_s25 = sshll.u32 %s1074_s9, 4  ;;  %s989_s25 = int_to_ptr.vmem [resolvable:$false] %s988_s25 }
  0x55   : > { %s990_s10 = scalar_lea.vmem %s989_s25, 2048  ;;  %p991_p4 = scmp.lt.s32.totalorder %s1238_s24, %s989_s25 }
  0x56   : > { %p986_p2 = pnand %p984_p12, %p970_p0  ;;  %p992_p13 = scmp.lt.s32.totalorder %s990_s10, %s983_s8 }
  0x58   : > { %p987_p5 = pneg %p986_p2  ;;  %p993_p6 = por %p992_p13, %p991_p4 }
  0x5a   : > { %p994_p10 = pnand %p993_p6, %p987_p5 }
  0x5c   : > { %997 = shalt.err (!%p994_p10)
}
  0x5d   : > { %s1075_s11 = smov 256   ;;  %s1076_s21 = smov 16  }
  0x5e   : > { %854 = dma.hbm_to_vmem [thread:$0]  (!%p1240_p11), %s1236_s17, 1024, %s1238_s24, %s1244_s27, %s1075_s11, %s1075_s11, %s1076_s21  }
  0x5f   : > { %179 = sbr.rel (%p1143_p8) target bundleno = 862 (0x35e), region = 32  ;;  %s1275_s28 = sand.u32 (!%p1143_p8), 1, %s1060_s13  }
  0x60   : > { %s755_s22 = sshll.u32 (!%p1143_p8), %s1275_s28, 6  ;;  %s182_s29 = scalar_lea.sflag (!%p1143_p8), [#allocation3], %s1275_s28 }
  0x61   : > { %s185_s30 = scalar_lea.vmem (!%p1143_p8), [#allocation2], %s755_s22  ;;  %p1367_p4 = scmp.ne.s32.totalorder (!%p1143_p8), %s1360_s18, 0 }
  0x66   : > { %1043 = dma.done.wait (%p1367_p4), %s182_s29, 1024  }
  0x67   : > { %1045 = vsyncadd (%p1367_p4), %s182_s29, 4294966272  ;;  %p1368_p5 = scmp.eq.s32.totalorder %s1124_s16, 0 }
  0x69   : > { %1047 = dma.done.wait (%p1368_p5), [#allocation6], 544   ;;  %p1369_p11 = pmov %p1368_p5 }
  0x6a   : > { %v220_v0 = vld [vmem:[%s185_s30 + $0x20] sm:$0xff]  ;;  %v221_v1 = vld [vmem:[%s185_s30 + $0x28] sm:$0xff]  ;;  %v222_v5 = vld [vmem:[%s185_s30 + $0x30] sm:$0xff]  ;;  %v1077_v19 = vmov 0.0|0.0   ;;  %vm1078_vm0 = vmmov 0   ;;  %v1079_v23 = vmov 0.0   ;;  %v261_v24 = vlaneseq }
  0x6b   : > { %1049 = vsyncadd (%p1369_p11), [#allocation6], 4294966752  ;;  %v216_v2 = vld [vmem:[%s185_s30] sm:$0xff]  ;;  %v230_v3 = vadd.f32 %v221_v1, %v220_v0  ;;  %v217_v4 = vld [vmem:[%s185_s30 + $0x8] sm:$0xff]  ;;  %v247_v15 = vmax.f32 %v220_v0, %v221_v1  ;;  %819 = vmatprep.subr.bf16.mxu0 %v1077_v19  ;;  %825 = vmatprep.subr.bf16.mxu1 %v1077_v19  ;;  %vm272_vm1 = vcmask 130112   ;;  %vm279_vm2 = vcmask 195712  }
  0x6c   : > { %v223_v6 = vld [vmem:[%s185_s30 + $0x38] sm:$0xff]  ;;  %v224_v7 = vadd.f32 %v217_v4, %v216_v2  ;;  %v218_v8 = vld [vmem:[%s185_s30 + $0x10] sm:$0xff]  ;;  %v241_v13 = vmax.f32 %v216_v2, %v217_v4  ;;  %v253_v16 = vld [vmem:[#allocation5] sm:$0xff]  ;;  %795 = vmatprep.mubr.msk.f32.mxu0 %vm1078_vm0, %v1079_v23  ;;  %806 = vmatprep.mubr.msk.f32.mxu1 %vm1078_vm0, %v1079_v23  ;;  %v262_v25 = vand.u32 127, %v261_v24  ;;  %v1289_v26 = vshrl.u32 %v261_v24, 7  ;;  %s758_s18 = sshll.u32 %s1275_s28, 5 }
  0x6d   : > { %v219_v9 = vld [vmem:[%s185_s30 + $0x18] sm:$0xff]  ;;  %231 = vadd.xlane.f32.xlu1 %v230_v3  ;;  %v233_v10 = vadd.f32 %v223_v6, %v222_v5  ;;  %v250_v14 = vmax.f32 %v222_v5, %v223_v6  ;;  %v254_v17 = vld [vmem:[#allocation5 + $0x8] sm:$0xff]  ;;  %v255_v20 = vld [vmem:[#allocation5 + $0x10] sm:$0xff]  ;;  %vm286_vm3 = vcmask 261312   ;;  %vm288_vm4 = vcmask 261120   ;;  %s215_s20 = scalar_lea.vmem [#allocation8], %s758_s18 }
  0x6e   : > { %225 = vadd.xlane.f32.xlu0 %v224_v7  ;;  %v227_v11 = vadd.f32 %v219_v9, %v218_v8  ;;  %v244_v12 = vmax.f32 %v218_v8, %v219_v9  ;;  %v820_v18 = vpack.c.bf16 %v254_v17, %v253_v16  ;;  %v256_v21 = vld [vmem:[#allocation5 + $0x18] sm:$0xff]  ;;  %v281_v28 = vadd.s32 4294967272, %v262_v25  ;;  %v362_v60 = vld [vmem:[#allocation7] sm:$0x3]  ;;  %s654_s17 = sshll.u32 %s215_s20, 4  ;;  %s772_s24 = sshll.u32 %s1124_s16, 9  ;;  %s1304_s17 = int_to_ptr.vmem [resolvable:$true] %s654_s17 }
  0x6f   : > { %v823_v22 = vpack.c.bf16 %v256_v21, %v255_v20  ;;  %v267_v29 = vadd.s32 4294967288, %v262_v25  ;;  %v274_v30 = vadd.s32 4294967280, %v262_v25  ;;  %v265_v32 = vsub.s32 %v262_v25, %v1289_v26  ;;  %s1309_s23 = scalar_lea.hbm %s1356_s3, %s772_s24  ;;  %s641_s5 = scalar_lea.sflag [#allocation4], %s1275_s28 }
  0x70   : > { %821 = vmatpush3.bf16.msra.mxu0 %v820_v18  ;;  %827 = vmatpush3.bf16.msra.mxu1 %v820_v18  ;;  %v284_v34 = vsub.s32 %v281_v28, %v1289_v26  ;;  %vm463_vm5 = vcmask 1041408   ;;  %vm459_vm6 = vcmask 15360   ;;  %vm635_vm7 = vcmask 7168   ;;  %s998_s8 = scalar_lea.vmem %s1304_s17, 512  ;;  %p1370_p0 = scmp.ne.s32.totalorder %s1365_s6, 0 }
  0x71   : > { %234 = vadd.xlane.f32.xlu1 %v233_v10  ;;  %822 = vmatprep.subr.bf16.mxu0 %v1077_v19  ;;  %v270_v36 = vsub.s32 %v267_v29, %v1289_v26  ;;  %v277_v37 = vsub.s32 %v274_v30, %v1289_v26  ;;  %p999_p8 = scmp.ne.s32.totalorder %s1304_s17, %s998_s8  ;;  %s1080_s16 = smov [#allocation8]  }
  0x72   : > { %228 = vadd.xlane.f32.xlu0 %v227_v11  ;;  %828 = vmatprep.subr.bf16.mxu1 %v1077_v19  ;;  %v618_v11 = vsub.s32 0, %v1289_v26  ;;  %s1002_s9 = sshll.u32 %s1080_s16, 4  ;;  %s1003_s9 = int_to_ptr.vmem [resolvable:$false] %s1002_s9 }
  0x73   : > { %p1000_p1 = pnand %p999_p8, %p1370_p0  ;;  %s1004_s25 = scalar_lea.vmem %s1003_s9, 1024 }
  0x74   : > { %824 = vmatpush3.bf16.msra.mxu0 %v823_v22  ;;  %830 = vmatpush3.bf16.msra.mxu1 %v823_v22  ;;  %p1005_p7 = scmp.lt.s32.totalorder %s1304_s17, %s1003_s9  ;;  %p1006_p9 = scmp.lt.s32.totalorder %s1004_s25, %s998_s8 }
  0x75   : > { %245 = vmax.xlane.f32.xlu1 %v244_v12  ;;  %814 = vmatprep.subr.mxu0 %v1079_v23  ;;  %p1001_p3 = pneg %p1000_p1 }
  0x76   : > { %242 = vmax.xlane.f32.xlu0 %v241_v13  ;;  %809 = vmatprep.subr.mxu1 %v1079_v23  ;;  %p1007_p12 = por %p1006_p9, %p1005_p7 }
  0x78   : > { %p1008_p2 = pnand %p1007_p12, %p1001_p3 }
  0x79   : > { %251 = vmax.xlane.f32.xlu1 %v250_v14 }
  0x7a   : > { %248 = vmax.xlane.f32.xlu0 %v247_v15 }
  0xfa   : > { %v232_v27 = vpop.xlane.xlu1 %231 }
  0xfb   : > { %v226_v31 = vpop.xlane.xlu0 %225  ;;  %v239_v38 = vmul.f32 0.00390625, %v232_v27 }
  0xfc   : > { %v237_v33 = vmul.f32 0.00390625, %v226_v31 }
  0xfd   : > { %v278_v46 = vrot.slane %v239_v38, %v277_v37 }
  0xfe   : > { %v235_v35 = vpop.xlane.xlu1 %234  ;;  %v266_v42 = vrot.slane %v237_v33, %v265_v32 }
  0xff   : > { %v240_v39 = vmul.f32 0.00390625, %v235_v35  ;;  %v229_v40 = vpop.xlane.xlu0 %228 }
 0x100   : > { %v238_v41 = vmul.f32 0.00390625, %v229_v40 }
 0x101   : > { %v285_v43 = vrot.slane %v240_v39, %v284_v34 }
 0x102   : > { %v271_v44 = vrot.slane %v238_v41, %v270_v36  ;;  %v246_v45 = vpop.xlane.xlu1 %245 }
 0x103   : > { %v243_v47 = vpop.xlane.xlu0 %242  ;;  %v374_v49 = vrot.slane %v246_v45, %v270_v36 }
 0x104   : > { %v273_v48 = vsel %vm272_vm1, %v271_v44, %v266_v42  ;;  %v370_v50 = vrot.slane %v243_v47, %v265_v32 }
 0x105   : > { %v280_v51 = vsel %vm279_vm2, %v278_v46, %v273_v48 }
 0x106   : > { %v287_v52 = vsel %vm286_vm3, %v285_v43, %v280_v51  ;;  %v252_v53 = vpop.xlane.xlu1 %251  ;;  %v375_v57 = vsel %vm272_vm1, %v374_v49, %v370_v50 }
 0x107   : > { %796 = vmatmul.mubr.msk.f32.vlgmr.msra.gmra.mrb[0].mxu0 %vm288_vm4, %v287_v52  ;;  %v249_v54 = vpop.xlane.xlu0 %248  ;;  %v384_v55 = vrot.slane %v252_v53, %v284_v34 }
 0x108   : > { %v379_v56 = vrot.slane %v249_v54, %v277_v37  ;;  %816 = vmatprep.mubr.msk.f32.mxu0 %vm1078_vm0, %v1079_v23  ;;  %815 = vmatpush3.msk.msra.mxu0 %vm463_vm5, %v362_v60 }
 0x10a   : > { %v380_v58 = vsel %vm279_vm2, %v379_v56, %v375_v57 }
 0x10b   : > { %v385_v59 = vsel %vm286_vm3, %v384_v55, %v380_v58 }
 0x10c   : > { %807 = vmatmul.mubr.msk.f32.vlgmr.msra.gmra.mrb[0].mxu1 %vm288_vm4, %v385_v59 }
 0x10d   : > { %811 = vmatprep.mubr.msk.f32.mxu1 %vm1078_vm0, %v1079_v23  ;;  %810 = vmatpush3.msk.msra.mxu1 %vm463_vm5, %v362_v60 }
 0x1da   : > { %v357_v61 = vpop.f32.mrb[0].mxu0 }
 0x1db   : > { %v361_v62 = vmax.f32 %v357_v61, 0.0  ;;  %v797_v63 = vpop.f32.mrb[1].mxu0 }
 0x1dd   : > { %817 = vmatmul.mubr.msk.f32.vlgmr.msra.gmra.mrb[2].mxu0 %vm459_vm6, %v361_v62 }
 0x1df   : > { %v454_v0 = vpop.f32.mrb[0].mxu1 }
 0x1e0   : > { %v458_v1 = vmax.f32 %v454_v0, 0.0  ;;  %v808_v2 = vpop.f32.mrb[1].mxu1 }
 0x1e2   : > { %812 = vmatmul.mubr.msk.f32.vlgmr.msra.gmra.mrb[2].mxu1 %vm459_vm6, %v458_v1 }
 0x2b0   : > { %v606_v3 = vpop.f32.mrb[2].mxu0 }
 0x2b1   : > { %v818_v4 = vpop.f32.mrb[3].mxu0 }
 0x2b5   : > { %v533_v5 = vpop.f32.mrb[2].mxu1 }
 0x2b6   : > { %v607_v6 = vadd.f32 %v606_v3, %v533_v5  ;;  %v813_v7 = vpop.f32.mrb[3].mxu1 }
 0x2b8   : > { %v765_v8 = vmul.f32 -1.442695, %v607_v6 }
 0x2ba   : > { %908 = vpow2.f32 %v765_v8 }
 0x2c4   : > { %v909_v9 = vpop.eup %908 }
 0x2c5   : > { %v613_v10 = vadd.f32 1.0, %v909_v9 }
 0x2c7   : > { %910 = vrcp.f32 %v613_v10 }
 0x2d1   : > { %v911_v12 = vpop.eup %910 }
 0x2d2   : > { %v619_v13 = vrot.slane %v911_v12, %v618_v11 }
 0x2d4   : > { %625 = vbcast.lane.b32.xlu1 %v619_v13, 264  ;;  %621 = vbcast.lane.b32.xlu0 %v619_v13, 256 }
 0x2d8   : > { %629 = vbcast.lane.b32.xlu1 %v619_v13, 272 }
 0x2dc   : > { %633 = vbcast.lane.b32.xlu1 %v619_v13, 280 }
 0x346   : > { %v626_v14 = vpop.permute.xlu1 %625  ;;  %v622_v15 = vpop.permute.xlu0 %621 }
 0x347   : > { %637 = vst.msk [vmem:[%s215_s20 + $0x8] sm:$0xff] %vm635_vm7, %v626_v14  ;;  %636 = vst.msk [vmem:[%s215_s20] sm:$0xff] %vm635_vm7, %v622_v15 }
 0x34a   : > { %v630_v16 = vpop.permute.xlu1 %629 }
 0x34b   : > { %638 = vst.msk [vmem:[%s215_s20 + $0x10] sm:$0xff] %vm635_vm7, %v630_v16 }
 0x34e   : > { %v634_v17 = vpop.permute.xlu1 %633 }
 0x34f   : > { %639 = vst.msk [vmem:[%s215_s20 + $0x18] sm:$0xff] %vm635_vm7, %v634_v17 }
 0x350   : > { %1011 = shalt.err (!%p1008_p2)
}
 0x351   : > { %s1012_s10 = scalar_lea.hbm %s1309_s23, 512  ;;  %s1016_s22 = scalar_lea.hbm %s1356_s3, 1024 }
 0x352   : > { %p1013_p13 = scmp.ne.s32.totalorder %s1309_s23, %s1012_s10  ;;  %p1017_p4 = scmp.lt.u32.totalorder %s1309_s23, %s1356_s3 }
 0x353   : > { %p1018_p5 = scmp.lt.u32.totalorder %s1016_s22, %s1012_s10  ;;  %p1020_p8 = scmp.lt.u32.totalorder %s1012_s10, %s1309_s23 }
 0x354   : > { %p1014_p6 = pnand %p1013_p13, %p1370_p0 }
 0x355   : > { %p1019_p11 = por %p1018_p5, %p1017_p4 }
 0x356   : > { %p1015_p10 = pneg %p1014_p6 }
 0x357   : > { %p1021_p1 = por %p1020_p8, %p1019_p11 }
 0x359   : > { %p1022_p3 = pnand %p1021_p1, %p1015_p10 }
 0x35b   : > { %1025 = shalt.err (!%p1022_p3)
}
 0x35c   : > { %s1081_s18 = smov 128   ;;  %s1082_s20 = smov 8  }
 0x35d   : > { %842 = dma.vmem_to_hbm [thread:$0]  (%p1370_p0), %s1304_s17, 512, %s1309_s23, %s641_s5, %s1081_s18, %s1081_s18, %s1082_s20  }
 0x35e PF: > { %s669_s24 = sand.u32 1, %s1056_s12   ;;  %p1371_p7 = scmp.ne.s32.totalorder %s1361_s19, 0 }
 0x35f   : > { %p1372_p9 = scmp.ge.s32.totalorder %s1068_s15, 2  ;;  %s670_s26 = scalar_lea.sflag [#allocation4], %s669_s24 }
 0x361   : > { %p856_p12 = pnand %p1372_p9, %p1371_p7 }
 0x363   : > { %1051 = dma.done.wait (!%p856_p12), %s670_s26, 512  }
 0x364   : > { %1053 = vsyncadd (!%p856_p12), %s670_s26, 4294966784  ;;  %p17_p2 = scmp.ge.s32.totalorder %s1213_s4, 4   ;;  %s1373_s12 = smov %s1060_s13 }
 0x365   : > { %s1374_s13 = smov %s1064_s14  ;;  %s1375_s14 = smov %s1229_s7 }
 0x366   : > { %s1376_s15 = smov %s1213_s4  ;;  %19 = sbr.rel (!%p17_p2) target bundleno = 6 (0x6), region = 85 }
 0x36d   :  { %675 = vsyncpa [#allocation3], 1 }
 0x36e   :  { %677 = vsyncpa [#allocation3 + $0x1], 1 }
 0x36f   :  { %678 = vsyncpa [#allocation6], 1 }
 0x370   :  { %679 = vsyncpa [#allocation4], 1 }
 0x371   :  { %681 = vsyncpa [#allocation4 + $0x1], 1 }

</bundles_post_ra>
